<compile_context>
chip_gen: v5e
topology: v5e:2x2
jax: 0.10.0
libtpu: 0.0.40
codegen_flags: <defaults>
</compile_context>

<pallas_src>
import functools

import jax
import jax.numpy as jnp
from jax.experimental import pallas as pl
from jax.experimental.pallas import tpu as pltpu

EPS = 1e-5  # nn.LayerNorm default


def _tmb_kernel(x_ref, w_ref, b_ref, g_ref, beta_ref, o_ref, *, K, L, b_tile):
    """One batch tile per grid step.

    x_ref:    (b_tile, L + 2*pad, Cin)  lane-dense, zero-padded, MXU dtype
    w_ref:    (K*Cin, Cout)             conv weight, tap-major rows (VMEM-resident)
    b_ref:    (1, Cout)                 conv bias (f32)
    g_ref:    (1, Cout)                 LayerNorm weight (f32)
    beta_ref: (1, Cout)                 LayerNorm bias (f32)
    o_ref:    (b_tile, L, Cout)         output block
    """
    cin = x_ref.shape[-1]
    cout = w_ref.shape[-1]
    M = b_tile * L

    # K shifted window loads of the pre-padded block build the im2col operand
    # directly in the MXU dtype (no per-batch unroll, no rolls, no masks);
    # leading-dim merge reshapes are layout-free (L is a sublane multiple).
    taps = [x_ref[:, k:k + L, :].reshape(M, cin) for k in range(K)]
    im2col = taps[0] if K == 1 else jnp.concatenate(taps, axis=-1)   # (M, K*Cin)

    # Whole Conv1d = one MXU dot (contraction depth K*Cin), f32 accumulation.
    acc = jnp.dot(im2col, w_ref[...], preferred_element_type=jnp.float32)
    acc = acc + b_ref[...]                                            # (M, Cout)

    # LayerNorm over the embed (lane) axis, f32 math.
    mean = jnp.mean(acc, axis=-1, keepdims=True)
    centered = acc - mean
    var = jnp.mean(centered * centered, axis=-1, keepdims=True)
    y = centered * jax.lax.rsqrt(var + EPS) * g_ref[...] + beta_ref[...]

    # Single unmasked, lane-dense full-block store.
    o_ref[...] = y.reshape(b_tile, L, cout).astype(o_ref.dtype)


def _num_tensorcores():
    """Best-effort TensorCore-per-chip query (v7x = 2); falls back to 1."""
    try:
        info = pltpu.get_tpu_info()
    except Exception:
        return 1
    for name in ("num_cores", "core_count", "num_tensorcores",
                 "tensorcore_count", "cores_per_chip", "num_cores_per_chip"):
        v = getattr(info, name, None)
        if isinstance(v, int) and 1 <= v <= 64:
            return int(v)
    return 1


def temporal_merging_block(x_ncl, w, b, gamma, beta, *, kernel_size=3,
                           compute_dtype=None, target_rows=512):
    """x_ncl: (B, Cin, L) -> (B, L, Cout), matching the PyTorch forward.

    compute_dtype: MXU operand dtype. Default: bfloat16 when the input is f32
    (v5e/v6e/v7x all run bf16 MXU natively); accumulation, bias add and
    LayerNorm are always f32.  Pass jnp.float32 for the exact-precision path.
    """
    B, Cin, L = x_ncl.shape
    K = kernel_size
    if K % 2 != 1:
        # PyTorch Conv1d with padding=K//2 yields length L+1 for even K.
        raise ValueError("temporal_merging_block: only odd kernel_size is supported")
    Cout = w.shape[0]
    pad = K // 2
    Lp = L + 2 * pad

    if compute_dtype is None:
        cdt = jnp.bfloat16 if x_ncl.dtype == jnp.float32 else x_ncl.dtype
    else:
        cdt = compute_dtype
    out_dtype = x_ncl.dtype

    # One fused wrapper HBM pass: NCL->NLC transpose + cast to MXU dtype +
    # zero-pad the length axis.  The kernel then only does shifted VMEM loads.
    x_pad = jnp.pad(jnp.transpose(x_ncl, (0, 2, 1)).astype(cdt),
                    ((0, 0), (pad, pad), (0, 0)))                    # (B, Lp, Cin)

    # PyTorch (Cout, Cin, K) -> tap-major (K*Cin, Cout); stays VMEM-resident.
    w2 = jnp.transpose(w, (2, 1, 0)).reshape(K * Cin, Cout).astype(cdt)
    b2 = b.reshape(1, Cout).astype(jnp.float32)
    g2 = gamma.reshape(1, Cout).astype(jnp.float32)
    beta2 = beta.reshape(1, Cout).astype(jnp.float32)

    in_item = jnp.dtype(cdt).itemsize
    out_item = jnp.dtype(out_dtype).itemsize
    sub = 16 if in_item < 4 else 8          # sublane tiling of the MXU dtype

    def _rup(n, m):
        return -(-n // m) * m

    def _step_vmem(bt):
        m = bt * L
        blocks = bt * _rup(Lp, sub) * _rup(Cin, 128) * in_item       # input block
        blocks += _rup(K * Cin, sub) * _rup(Cout, 128) * in_item     # weight slab
        blocks += bt * _rup(L, 8) * _rup(Cout, 128) * out_item       # output block
        blocks *= 2                                                  # double-buffered
        vec = m * K * _rup(Cin, 128) * in_item                       # im2col value
        vec += 3 * m * _rup(Cout, 128) * 4                           # acc + LN temps
        return blocks + vec

    n_cores = _num_tensorcores()

    # Batch tile: M = b_tile*L >= target_rows rows per dot, capped by B, by the
    # per-core share on multi-TC chips (v7x), and by a per-step VMEM budget.
    b_tile = min(B, max(1, -(-target_rows // L)))
    if n_cores > 1:
        b_tile = min(b_tile, max(1, -(-B // n_cores)))
    while b_tile > 1 and _step_vmem(b_tile) > (10 << 20):
        b_tile -= 1
    # Prefer a b_tile dividing B (avoids a ragged tail tile) if one is nearby.
    for cand in range(b_tile, max(0, b_tile // 2), -1):
        if B % cand == 0:
            b_tile = cand
            break

    grid_b = pl.cdiv(B, b_tile)
    vmem_limit = int(min(48 << 20, max(2 * _step_vmem(b_tile) + (4 << 20), 32 << 20)))

    kernel = functools.partial(_tmb_kernel, K=K, L=L, b_tile=b_tile)

    return pl.pallas_call(
        kernel,
        out_shape=jax.ShapeDtypeStruct((B, L, Cout), out_dtype),
        grid_spec=pltpu.PrefetchScalarGridSpec(
            num_scalar_prefetch=0,
            grid=(grid_b,),
            in_specs=[
                pl.BlockSpec((b_tile, Lp, Cin), lambda i: (i, 0, 0)),
                pl.BlockSpec((K * Cin, Cout), lambda i: (0, 0)),
                pl.BlockSpec((1, Cout), lambda i: (0, 0)),
                pl.BlockSpec((1, Cout), lambda i: (0, 0)),
                pl.BlockSpec((1, Cout), lambda i: (0, 0)),
            ],
            out_specs=pl.BlockSpec((b_tile, L, Cout), lambda i: (i, 0, 0)),
        ),
        compiler_params=pltpu.CompilerParams(
            dimension_semantics=("parallel",),
            vmem_limit_bytes=vmem_limit,
        ),
    )(x_pad, w2, b2, g2, beta2)


def reference(x_ncl, w, b, gamma, beta, kernel_size=3):
    """Pure-JAX reference matching the PyTorch forward exactly."""
    pad = kernel_size // 2
    y = jax.lax.conv_general_dilated(
        x_ncl.astype(jnp.float32),
        w.astype(jnp.float32),
        window_strides=(1,),
        padding=[(pad, pad)],
        dimension_numbers=("NCH", "OIH", "NCH"),
    ) + b.astype(jnp.float32)[None, :, None]
    y = jnp.transpose(y, (0, 2, 1))                               # (B, L, Cout)
    mean = jnp.mean(y, axis=-1, keepdims=True)
    var = jnp.mean((y - mean) ** 2, axis=-1, keepdims=True)
    return (y - mean) * jax.lax.rsqrt(var + EPS) * gamma + beta


if __name__ == "__main__":
    # Small, module-consistent shapes (lane-aligned channel counts).
    B, Cin, L = 2, 128, 16
    K, Cout = 3, 128

    key = jax.random.PRNGKey(0)
    kx, kw = jax.random.split(key)

    x = jax.random.normal(kx, (B, Cin, L), dtype=jnp.float32)

    # Deterministic init mirroring the PyTorch _init_weights:
    #   Conv1d weight ~ N(0, sqrt(2 / fan_out)), fan_out = K * Cout; bias = 0.
    #   LayerNorm weight = 1, bias = 0.
    std = (2.0 / (K * Cout)) ** 0.5
    w = std * jax.random.normal(kw, (Cout, Cin, K), dtype=jnp.float32)
    b = jnp.zeros((Cout,), dtype=jnp.float32)
    gamma = jnp.ones((Cout,), dtype=jnp.float32)
    beta = jnp.zeros((Cout,), dtype=jnp.float32)

    # Exact-precision path (f32 MXU operands): tight check vs the reference.
    out_f32 = temporal_merging_block(x, w, b, gamma, beta, kernel_size=K,
                                     compute_dtype=jnp.float32)
    out_f32 = jax.block_until_ready(out_f32)
    ref = reference(x, w, b, gamma, beta, kernel_size=K)
    assert out_f32.shape == (B, L, Cout), out_f32.shape
    assert jnp.allclose(out_f32, ref, atol=1e-4, rtol=1e-4), float(
        jnp.max(jnp.abs(out_f32 - ref)))

    # Default path: bf16 MXU operands (all generations), f32 accumulation / LN.
    # Compared against the reference evaluated on the same bf16-rounded inputs
    # (documented precision/perf tradeoff of the bf16 operand path).
    out = temporal_merging_block(x, w, b, gamma, beta, kernel_size=K)
    out = jax.block_until_ready(out)
    ref_bf = reference(x.astype(jnp.bfloat16).astype(jnp.float32),
                       w.astype(jnp.bfloat16).astype(jnp.float32),
                       b, gamma, beta, kernel_size=K)
    assert out.shape == (B, L, Cout), out.shape
    assert jnp.allclose(out, ref_bf, atol=2e-2, rtol=2e-2), float(
        jnp.max(jnp.abs(out - ref_bf)))

    print("KERNEL_OK")
</pallas_src>

<mosaic_0001>
module attributes {stable_mosaic.version = 11 : i64} {
  func.func @_tmb_kernel(%arg0: i32, %arg1: memref<2x18x128xf32, #tpu.memory_space<vmem>>, %arg2: memref<384x128xf32, #tpu.memory_space<vmem>>, %arg3: memref<1x128xf32, #tpu.memory_space<vmem>>, %arg4: memref<1x128xf32, #tpu.memory_space<vmem>>, %arg5: memref<1x128xf32, #tpu.memory_space<vmem>>, %arg6: memref<2x16x128xf32, #tpu.memory_space<vmem>>) attributes {dimension_semantics = [#tpu.dimension_semantics<parallel>], iteration_bounds = array<i64: 1>, scalar_prefetch = 0 : i64, scratch_operands = 0 : i64, tpu.core_type = #tpu.core_type<tc>, window_params = [{transform_indices = @transform_0, window_bounds = array<i64: 2, 18, 128>}, {pipeline_mode = #tpu.pipeline_mode<synchronous>, transform_indices = @transform_1, window_bounds = array<i64: 384, 128>}, {pipeline_mode = #tpu.pipeline_mode<synchronous>, transform_indices = @transform_2, window_bounds = array<i64: 1, 128>}, {pipeline_mode = #tpu.pipeline_mode<synchronous>, transform_indices = @transform_3, window_bounds = array<i64: 1, 128>}, {pipeline_mode = #tpu.pipeline_mode<synchronous>, transform_indices = @transform_4, window_bounds = array<i64: 1, 128>}, {transform_indices = @transform_5, window_bounds = array<i64: 2, 16, 128>}]} {
    %c0 = arith.constant 0 : index
    %c0_0 = arith.constant 0 : index
    %c0_1 = arith.constant 0 : index
    %0 = vector.load %arg1[%c0, %c0_0, %c0_1] : memref<2x18x128xf32, #tpu.memory_space<vmem>>, vector<2x16x128xf32>
    %1 = vector.shape_cast %0 : vector<2x16x128xf32> to vector<32x128xf32>
    %c0_2 = arith.constant 0 : index
    %c1 = arith.constant 1 : index
    %c0_3 = arith.constant 0 : index
    %2 = vector.load %arg1[%c0_2, %c1, %c0_3] : memref<2x18x128xf32, #tpu.memory_space<vmem>>, vector<2x16x128xf32>
    %3 = vector.shape_cast %2 : vector<2x16x128xf32> to vector<32x128xf32>
    %c0_4 = arith.constant 0 : index
    %c2 = arith.constant 2 : index
    %c0_5 = arith.constant 0 : index
    %4 = vector.load %arg1[%c0_4, %c2, %c0_5] : memref<2x18x128xf32, #tpu.memory_space<vmem>>, vector<2x16x128xf32>
    %5 = vector.shape_cast %4 : vector<2x16x128xf32> to vector<32x128xf32>
    %6 = tpu.concatenate %1, %3, %5 in 1 : vector<32x128xf32>, vector<32x128xf32>, vector<32x128xf32> -> vector<32x384xf32>
    %c0_6 = arith.constant 0 : index
    %c0_7 = arith.constant 0 : index
    %7 = vector.load %arg2[%c0_6, %c0_7] : memref<384x128xf32, #tpu.memory_space<vmem>>, vector<384x128xf32>
    %cst = arith.constant dense<0.000000e+00> : vector<32x128xf32>
    %8 = tpu.matmul %6, %7, %cst {dimension_numbers = #tpu.dot_dimension_numbers<[1], [0], [0], [1], [0, 0, 1, 1], [], []>} : vector<32x384xf32>, vector<384x128xf32>, vector<32x128xf32> -> vector<32x128xf32>
    %c0_8 = arith.constant 0 : index
    %c0_9 = arith.constant 0 : index
    %9 = vector.load %arg3[%c0_8, %c0_9] : memref<1x128xf32, #tpu.memory_space<vmem>>, vector<1x128xf32>
    %10 = vector.broadcast %9 : vector<1x128xf32> to vector<32x128xf32>
    %11 = arith.addf %8, %10 : vector<32x128xf32>
    %cst_10 = arith.constant dense<0.000000e+00> : vector<32xf32>
    %12 = vector.multi_reduction <add>, %11, %cst_10 [1] : vector<32x128xf32> to vector<32xf32>
    %13 = vector.shape_cast %12 : vector<32xf32> to vector<32x1xf32>
    %cst_11 = arith.constant 1.280000e+02 : f32
    %14 = vector.broadcast %cst_11 : f32 to vector<32x1xf32>
    %15 = arith.divf %13, %14 : vector<32x1xf32>
    %16 = vector.broadcast %15 : vector<32x1xf32> to vector<32x128xf32>
    %17 = arith.subf %11, %16 : vector<32x128xf32>
    %18 = arith.mulf %17, %17 : vector<32x128xf32>
    %cst_12 = arith.constant dense<0.000000e+00> : vector<32xf32>
    %19 = vector.multi_reduction <add>, %18, %cst_12 [1] : vector<32x128xf32> to vector<32xf32>
    %20 = vector.shape_cast %19 : vector<32xf32> to vector<32x1xf32>
    %cst_13 = arith.constant 1.280000e+02 : f32
    %21 = vector.broadcast %cst_13 : f32 to vector<32x1xf32>
    %22 = arith.divf %20, %21 : vector<32x1xf32>
    %cst_14 = arith.constant 9.99999974E-6 : f32
    %23 = vector.broadcast %cst_14 : f32 to vector<32x1xf32>
    %24 = arith.addf %22, %23 : vector<32x1xf32>
    %25 = math.rsqrt %24 : vector<32x1xf32>
    %26 = vector.broadcast %25 : vector<32x1xf32> to vector<32x128xf32>
    %27 = arith.mulf %17, %26 : vector<32x128xf32>
    %c0_15 = arith.constant 0 : index
    %c0_16 = arith.constant 0 : index
    %28 = vector.load %arg4[%c0_15, %c0_16] : memref<1x128xf32, #tpu.memory_space<vmem>>, vector<1x128xf32>
    %29 = vector.broadcast %28 : vector<1x128xf32> to vector<32x128xf32>
    %30 = arith.mulf %27, %29 : vector<32x128xf32>
    %c0_17 = arith.constant 0 : index
    %c0_18 = arith.constant 0 : index
    %31 = vector.load %arg5[%c0_17, %c0_18] : memref<1x128xf32, #tpu.memory_space<vmem>>, vector<1x128xf32>
    %32 = vector.broadcast %31 : vector<1x128xf32> to vector<32x128xf32>
    %33 = arith.addf %30, %32 : vector<32x128xf32>
    %34 = vector.shape_cast %33 : vector<32x128xf32> to vector<2x16x128xf32>
    %c0_19 = arith.constant 0 : index
    %c0_20 = arith.constant 0 : index
    %c0_21 = arith.constant 0 : index
    %35 = vector.load %arg6[%c0_19, %c0_20, %c0_21] : memref<2x16x128xf32, #tpu.memory_space<vmem>>, vector<2x16x128xf32>
    tpu.vector_store %arg6[%c0_19, %c0_20, %c0_21], %34 {strides = array<i32>} : memref<2x16x128xf32, #tpu.memory_space<vmem>>, vector<2x16x128xf32>,
    return
  }
  func.func @transform_0(%arg0: i32) -> (i32, i32, i32) {
    %c0_i32 = arith.constant 0 : i32
    %c0_i32_0 = arith.constant 0 : i32
    %c0_i32_1 = arith.constant 0 : i32
    return %arg0, %c0_i32, %c0_i32_0 : i32, i32, i32
  }
  func.func @transform_1(%arg0: i32) -> (i32, i32) {
    %c0_i32 = arith.constant 0 : i32
    %c0_i32_0 = arith.constant 0 : i32
    %c0_i32_1 = arith.constant 0 : i32
    return %c0_i32, %c0_i32_0 : i32, i32
  }
  func.func @transform_2(%arg0: i32) -> (i32, i32) {
    %c0_i32 = arith.constant 0 : i32
    %c0_i32_0 = arith.constant 0 : i32
    %c0_i32_1 = arith.constant 0 : i32
    return %c0_i32, %c0_i32_0 : i32, i32
  }
  func.func @transform_3(%arg0: i32) -> (i32, i32) {
    %c0_i32 = arith.constant 0 : i32
    %c0_i32_0 = arith.constant 0 : i32
    %c0_i32_1 = arith.constant 0 : i32
    return %c0_i32, %c0_i32_0 : i32, i32
  }
  func.func @transform_4(%arg0: i32) -> (i32, i32) {
    %c0_i32 = arith.constant 0 : i32
    %c0_i32_0 = arith.constant 0 : i32
    %c0_i32_1 = arith.constant 0 : i32
    return %c0_i32, %c0_i32_0 : i32, i32
  }
  func.func @transform_5(%arg0: i32) -> (i32, i32, i32) {
    %c0_i32 = arith.constant 0 : i32
    %c0_i32_0 = arith.constant 0 : i32
    %c0_i32_1 = arith.constant 0 : i32
    return %arg0, %c0_i32, %c0_i32_0 : i32, i32, i32
  }
}

</mosaic_0001>

<bundles_post_ra>
// kernel: tpu_custom_call.1
= control target key start
LH: loop header
LB: loop body
LE: loop exit
PB: predicated region body
PF: predicated region fallthrough
CT: control target
= control target key end

     0   :  { %10 = vsyncpa [#allocation3], 0  ;;  %s502_s0 = inlined_call_operand.vmem [shape: f32[2,18,128], index: 0, kind: input, shape index: {}]   ;;  %s503_s1 = inlined_call_operand.hbm [shape: f32[384,128], index: 1, kind: input, shape index: {}]   ;;  %s504_s2 = inlined_call_operand.vmem [shape: f32[1,128], index: 2, kind: input, shape index: {}]   ;;  %s505_s3 = inlined_call_operand.vmem [shape: f32[1,128], index: 3, kind: input, shape index: {}]   ;;  %s506_s4 = inlined_call_operand.vmem [shape: f32[1,128], index: 4, kind: input, shape index: {}]   ;;  %s507_s5 = inlined_call_operand.hbm [shape: f32[2,16,128], index: 5, kind: output, shape index: {}]  }
   0x1   :  { %11 = vsyncpa [#allocation4], 0  ;;  %s18_s20 = sshll.u32 %s503_s1, 4  ;;  %s400_s21 = smov [#allocation2]   ;;  %s19_s20 = int_to_ptr.hbm [resolvable:$true] %s18_s20 }
   0x2   :  { %s20_s22 = sshll.u32 %s400_s21, 4  ;;  %s401_s23 = smov 128   ;;  %s21_s22 = int_to_ptr.vmem [resolvable:$true] %s20_s22 }
   0x3   :  { %s402_s24 = smov 8  }
   0x4   :  { %26 = dma.hbm_to_vmem [thread:$0]  %s19_s20, 6144, %s21_s22, [#allocation3], %s401_s23, %s401_s23, %s402_s24  }
   0x5   :  { %396 = dma.done.wait [#allocation3], 6144  }
   0x6   :  { %397 = vsyncadd [#allocation3], 4294961152  ;;  %v96_v0 = vld [vmem:[#allocation2 + $0x178] sm:$0xff]  ;;  %v95_v2 = vld [vmem:[#allocation2 + $0x170] sm:$0xff]  ;;  %s301_s30 = sshll.u32 %s507_s5, 4  ;;  %s302_s30 = int_to_ptr.hbm [resolvable:$true] %s301_s30 }
   0x7   :  { %v64_v1 = vld [vmem:[#allocation2 + $0x78] sm:$0xff]  ;;  %159 = vmatpush.msra.mxu2 %v96_v0  ;;  %v63_v3 = vld [vmem:[#allocation2 + $0x70] sm:$0xff]  ;;  %v94_v5 = vld [vmem:[#allocation2 + $0x168] sm:$0xff] }
   0x8   :  { %101 = vmatpush.msra.mxu0 %v64_v1  ;;  %v80_v4 = vld [vmem:[#allocation2 + $0xf8] sm:$0xff]  ;;  %314 = vmatpush.msra.mxu3 %v64_v1  ;;  %v62_v6 = vld [vmem:[#allocation2 + $0x68] sm:$0xff]  ;;  %v79_v7 = vld [vmem:[#allocation2 + $0xf0] sm:$0xff] }
   0x9   :  { %130 = vmatpush.msra.mxu1 %v80_v4  ;;  %160 = vmatpush.msra.mxu2 %v95_v2  ;;  %v78_v8 = vld [vmem:[#allocation2 + $0xe8] sm:$0xff]  ;;  %v93_v9 = vld [vmem:[#allocation2 + $0x160] sm:$0xff]  ;;  %v92_v12 = vld [vmem:[#allocation2 + $0x158] sm:$0xff] }
   0xa   :  { %102 = vmatpush.msra.mxu0 %v63_v3  ;;  %315 = vmatpush.msra.mxu3 %v63_v3  ;;  %v61_v10 = vld [vmem:[#allocation2 + $0x60] sm:$0xff]  ;;  %v60_v13 = vld [vmem:[#allocation2 + $0x58] sm:$0xff]  ;;  %v91_v15 = vld [vmem:[#allocation2 + $0x150] sm:$0xff] }
   0xb   :  { %131 = vmatpush.msra.mxu1 %v79_v7  ;;  %161 = vmatpush.msra.mxu2 %v94_v5  ;;  %v77_v11 = vld [vmem:[#allocation2 + $0xe0] sm:$0xff]  ;;  %v76_v14 = vld [vmem:[#allocation2 + $0xd8] sm:$0xff]  ;;  %v59_v16 = vld [vmem:[#allocation2 + $0x50] sm:$0xff] }
   0xc   :  { %103 = vmatpush.msra.mxu0 %v62_v6  ;;  %316 = vmatpush.msra.mxu3 %v62_v6  ;;  %v75_v17 = vld [vmem:[#allocation2 + $0xd0] sm:$0xff]  ;;  %v90_v18 = vld [vmem:[#allocation2 + $0x148] sm:$0xff]  ;;  %v89_v21 = vld [vmem:[#allocation2 + $0x140] sm:$0xff] }
   0xd   :  { %132 = vmatpush.msra.mxu1 %v78_v8  ;;  %162 = vmatpush.msra.mxu2 %v93_v9  ;;  %v58_v19 = vld [vmem:[#allocation2 + $0x48] sm:$0xff]  ;;  %v57_v22 = vld [vmem:[#allocation2 + $0x40] sm:$0xff]  ;;  %v88_v24 = vld [vmem:[#allocation2 + $0x138] sm:$0xff] }
   0xe   :  { %104 = vmatpush.msra.mxu0 %v61_v10  ;;  %317 = vmatpush.msra.mxu3 %v61_v10  ;;  %v74_v20 = vld [vmem:[#allocation2 + $0xc8] sm:$0xff]  ;;  %v73_v23 = vld [vmem:[#allocation2 + $0xc0] sm:$0xff]  ;;  %v56_v25 = vld [vmem:[#allocation2 + $0x38] sm:$0xff] }
   0xf   :  { %133 = vmatpush.msra.mxu1 %v77_v11  ;;  %163 = vmatpush.msra.mxu2 %v92_v12  ;;  %v72_v26 = vld [vmem:[#allocation2 + $0xb8] sm:$0xff]  ;;  %v87_v27 = vld [vmem:[#allocation2 + $0x130] sm:$0xff]  ;;  %v86_v30 = vld [vmem:[#allocation2 + $0x128] sm:$0xff] }
  0x10   :  { %105 = vmatpush.msra.mxu0 %v60_v13  ;;  %318 = vmatpush.msra.mxu3 %v60_v13  ;;  %v55_v28 = vld [vmem:[#allocation2 + $0x30] sm:$0xff]  ;;  %v54_v31 = vld [vmem:[#allocation2 + $0x28] sm:$0xff]  ;;  %v85_v32 = vld [vmem:[#allocation2 + $0x120] sm:$0xff] }
  0x11   :  { %134 = vmatpush.msra.mxu1 %v76_v14  ;;  %164 = vmatpush.msra.mxu2 %v91_v15  ;;  %v71_v29 = vld [vmem:[#allocation2 + $0xb0] sm:$0xff]  ;;  %v70_v33 = vld [vmem:[#allocation2 + $0xa8] sm:$0xff]  ;;  %v53_v34 = vld [vmem:[#allocation2 + $0x20] sm:$0xff] }
  0x12   :  { %106 = vmatpush.msra.mxu0 %v59_v16  ;;  %319 = vmatpush.msra.mxu3 %v59_v16  ;;  %v69_v35 = vld [vmem:[#allocation2 + $0xa0] sm:$0xff]  ;;  %v84_v36 = vld [vmem:[#allocation2 + $0x118] sm:$0xff]  ;;  %v83_v39 = vld [vmem:[#allocation2 + $0x110] sm:$0xff] }
  0x13   :  { %135 = vmatpush.msra.mxu1 %v75_v17  ;;  %165 = vmatpush.msra.mxu2 %v90_v18  ;;  %v52_v37 = vld [vmem:[#allocation2 + $0x18] sm:$0xff]  ;;  %v51_v40 = vld [vmem:[#allocation2 + $0x10] sm:$0xff]  ;;  %v82_v42 = vld [vmem:[#allocation2 + $0x108] sm:$0xff] }
  0x14   :  { %107 = vmatpush.msra.mxu0 %v58_v19  ;;  %320 = vmatpush.msra.mxu3 %v58_v19  ;;  %v68_v38 = vld [vmem:[#allocation2 + $0x98] sm:$0xff]  ;;  %v67_v41 = vld [vmem:[#allocation2 + $0x90] sm:$0xff]  ;;  %v50_v43 = vld [vmem:[#allocation2 + $0x8] sm:$0xff] }
  0x15   :  { %136 = vmatpush.msra.mxu1 %v74_v20  ;;  %166 = vmatpush.msra.mxu2 %v89_v21  ;;  %v66_v44 = vld [vmem:[#allocation2 + $0x88] sm:$0xff]  ;;  %v81_v45 = vld [vmem:[#allocation2 + $0x100] sm:$0xff]  ;;  %v39_v53 = vld [vmem:[%s502_s0 + $0x18] sm:$0xff]  ;;  %v403_v21 = vmov 128.0  }
  0x16   :  { %108 = vmatpush.msra.mxu0 %v57_v22  ;;  %321 = vmatpush.msra.mxu3 %v57_v22  ;;  %v49_v46 = vld [vmem:[#allocation2] sm:$0xff]  ;;  %v38_v50 = vld [vmem:[%s502_s0 + $0x8] sm:$0xff]  ;;  %338 = vrcp.f32 %v403_v21 }
  0x17   :  { %137 = vmatpush.msra.mxu1 %v73_v23  ;;  %167 = vmatpush.msra.mxu2 %v88_v24  ;;  %v45_v47 = vld [vmem:[%s502_s0 + $0x2] sm:$0xff]  ;;  %v46_v52 = vld [vmem:[%s502_s0 + $0xa] sm:$0xff]  ;;  %v47_v55 = vld [vmem:[%s502_s0 + $0x1a] sm:$0xff] }
  0x18   :  { %109 = vmatpush.msra.mxu0 %v56_v25  ;;  %322 = vmatpush.msra.mxu3 %v56_v25  ;;  %v37_v48 = vld [vmem:[%s502_s0] sm:$0xff]  ;;  %v42_v54 = vld [vmem:[%s502_s0 + $0x9] sm:$0xff] }
  0x19   :  { %138 = vmatpush.msra.mxu1 %v72_v26  ;;  %168 = vmatpush.msra.mxu2 %v87_v27  ;;  %v65_v49 = vld [vmem:[#allocation2 + $0x80] sm:$0xff] }
  0x1a   :  { %110 = vmatpush.msra.mxu0 %v55_v28  ;;  %323 = vmatpush.msra.mxu3 %v55_v28  ;;  %v41_v51 = vld [vmem:[%s502_s0 + $0x1] sm:$0xff]  ;;  %v43_v57 = vld [vmem:[%s502_s0 + $0x19] sm:$0xff] }
  0x1b   :  { %139 = vmatpush.msra.mxu1 %v71_v29  ;;  %169 = vmatpush.msra.mxu2 %v86_v30  ;;  %v40_v56 = vld [vmem:[%s502_s0 + $0x20] sm:$0xff] }
  0x1c   :  { %111 = vmatpush.msra.mxu0 %v54_v31  ;;  %324 = vmatpush.msra.mxu3 %v54_v31  ;;  %v48_v58 = vld [vmem:[%s502_s0 + $0x22] sm:$0xff]  ;;  %v335_v60 = vld [vmem:[%s504_s2] ss:$0 sm:$0xff]  ;;  %v339_v22 = vpop.eup %338 }
  0x1d   :  { %140 = vmatpush.msra.mxu1 %v70_v33  ;;  %170 = vmatpush.msra.mxu2 %v85_v32  ;;  %v44_v59 = vld [vmem:[%s502_s0 + $0x21] sm:$0xff]  ;;  %v197_v23 = vmul.f32 128.0, %v339_v22  ;;  %vm201_vm0 = vweird.f32 %v339_v22 }
  0x1e   :  { %112 = vmatpush.msra.mxu0 %v53_v34  ;;  %325 = vmatpush.msra.mxu3 %v53_v34 }
  0x1f   :  { %141 = vmatpush.msra.mxu1 %v69_v35  ;;  %171 = vmatpush.msra.mxu2 %v84_v36  ;;  %v198_v24 = vsub.f32 1.0, %v197_v23 }
  0x20   :  { %113 = vmatpush.msra.mxu0 %v52_v37  ;;  %326 = vmatpush.msra.mxu3 %v52_v37 }
  0x21   :  { %142 = vmatpush.msra.mxu1 %v68_v38  ;;  %172 = vmatpush.msra.mxu2 %v83_v39  ;;  %v199_v25 = vmul.f32 %v339_v22, %v198_v24 }
  0x22   :  { %114 = vmatpush.msra.mxu0 %v51_v40  ;;  %327 = vmatpush.msra.mxu3 %v51_v40 }
  0x23   :  { %143 = vmatpush.msra.mxu1 %v67_v41  ;;  %173 = vmatpush.msra.mxu2 %v82_v42  ;;  %v200_v26 = vadd.f32 %v339_v22, %v199_v25 }
  0x24   :  { %115 = vmatpush.msra.mxu0 %v50_v43  ;;  %328 = vmatpush.msra.mxu3 %v50_v43 }
  0x25   :  { %144 = vmatpush.msra.mxu1 %v66_v44  ;;  %174 = vmatpush.msra.mxu2 %v81_v45  ;;  %v202_v27 = vsel %vm201_vm0, %v339_v22, %v200_v26 }
  0x26   :  { %116 = vmatpush.msra.mxu0 %v49_v46  ;;  %175 = vmatmul.f32.vlgmr.msra.gmra.mxu2 %v45_v47 }
  0x27   :  { %117 = vmatmul.f32.vlgmr.msra.gmra.mxu0 %v37_v48  ;;  %329 = vmatpush.msra.mxu3 %v49_v46 }
  0x28   :  { %145 = vmatpush.msra.mxu1 %v65_v49  ;;  %120 = vmatmul.f32.vlgmr.msra.gmra.mxu3 %v38_v50 }
  0x29   :  { %146 = vmatmul.f32.vlgmr.msra.gmra.mxu1 %v41_v51 }
  0x2e   :  { %178 = vmatmul.f32.gmra.mxu2 %v46_v52 }
  0x30   :  { %123 = vmatmul.f32.gmra.mxu3 %v39_v53 }
  0x31   :  { %149 = vmatmul.f32.gmra.mxu1 %v42_v54 }
  0x36   :  { %181 = vmatmul.f32.gmra.mxu2 %v47_v55 }
  0x38   :  { %126 = vmatmul.f32.gmra.mxu3 %v40_v56 }
  0x39   :  { %152 = vmatmul.f32.gmra.mxu1 %v43_v57 }
  0x3e   :  { %184 = vmatmul.f32.gmra.mxu2 %v48_v58 }
  0x41   :  { %155 = vmatmul.f32.gmra.mxu1 %v44_v59 }
  0xa4   :  { %v118_v61 = vpop.f32.mrf.mxu0 }
  0xa5   :  { %v119_v62 = vadd.f32 %v335_v60, %v118_v61  ;;  %v336_v61 = vld [vmem:[%s505_s3] ss:$0 sm:$0xff]  ;;  %s404_s3 = smov [#allocation5]  }
  0xa6   :  { %v147_v63 = vpop.f32.mrf.mxu1 }
  0xa7   :  { %v148_v0 = vadd.f32 %v147_v63, %v119_v62 }
  0xa9   :  { %v176_v1 = vpop.f32.mrf.mxu2 }
  0xaa   :  { %v177_v2 = vadd.f32 %v176_v1, %v148_v0  ;;  %v337_v1 = vld [vmem:[%s506_s4] ss:$0 sm:$0xff]  ;;  %s299_s4 = sshll.u32 %s404_s3, 4  ;;  %s300_s4 = int_to_ptr.vmem [resolvable:$true] %s299_s4 }
  0xab   :  { %v121_v3 = vpop.f32.mrf.mxu3 }
  0xac   :  { %188 = vadd.xlane.f32.xlu0 %v177_v2  ;;  %v122_v4 = vadd.f32 %v335_v60, %v121_v3 }
  0xae   :  { %v150_v5 = vpop.f32.mrf.mxu1 }
  0xaf   :  { %v151_v6 = vadd.f32 %v150_v5, %v122_v4 }
  0xb1   :  { %v179_v7 = vpop.f32.mrf.mxu2 }
  0xb2   :  { %v180_v8 = vadd.f32 %v179_v7, %v151_v6 }
  0xb3   :  { %v124_v9 = vpop.f32.mrf.mxu3 }
  0xb4   :  { %190 = vadd.xlane.f32.xlu0 %v180_v8  ;;  %v125_v10 = vadd.f32 %v335_v60, %v124_v9 }
  0xb6   :  { %v153_v11 = vpop.f32.mrf.mxu1 }
  0xb7   :  { %v154_v12 = vadd.f32 %v153_v11, %v125_v10 }
  0xb9   :  { %v182_v13 = vpop.f32.mrf.mxu2 }
  0xba   :  { %v183_v14 = vadd.f32 %v182_v13, %v154_v12 }
  0xbb   :  { %v127_v15 = vpop.f32.mrf.mxu3 }
  0xbc   :  { %192 = vadd.xlane.f32.xlu1 %v183_v14  ;;  %v128_v16 = vadd.f32 %v335_v60, %v127_v15 }
  0xbe   :  { %v156_v17 = vpop.f32.mrf.mxu1 }
  0xbf   :  { %v157_v18 = vadd.f32 %v156_v17, %v128_v16 }
  0xc1   :  { %v185_v19 = vpop.f32.mrf.mxu2 }
  0xc2   :  { %v186_v20 = vadd.f32 %v185_v19, %v157_v18 }
  0xc4   :  { %194 = vadd.xlane.f32.xlu1 %v186_v20 }
 0x11f   :  { %v189_v28 = vpop.xlane.xlu0 %188 }
 0x120   :  { %v203_v29 = vmul.f32 %v202_v27, %v189_v28 }
 0x122   :  { %v207_v30 = vsub.f32 %v177_v2, %v203_v29 }
 0x124   :  { %v211_v31 = vmul.f32 %v207_v30, %v207_v30 }
 0x126   :  { %215 = vadd.xlane.f32.xlu2 %v211_v31 }
 0x127   :  { %v191_v32 = vpop.xlane.xlu0 %190 }
 0x128   :  { %v204_v33 = vmul.f32 %v202_v27, %v191_v32 }
 0x12a   :  { %v208_v34 = vsub.f32 %v180_v8, %v204_v33 }
 0x12c   :  { %v212_v35 = vmul.f32 %v208_v34, %v208_v34 }
 0x12e   :  { %217 = vadd.xlane.f32.xlu2 %v212_v35 }
 0x12f   :  { %v193_v36 = vpop.xlane.xlu1 %192 }
 0x130   :  { %v205_v37 = vmul.f32 %v202_v27, %v193_v36 }
 0x132   :  { %v480_v38 = vsub.f32 %v183_v14, %v205_v37 }
 0x134   :  { %v213_v39 = vmul.f32 %v480_v38, %v480_v38 }
 0x136   :  { %219 = vadd.xlane.f32.xlu0 %v213_v39 }
 0x137   :  { %v195_v40 = vpop.xlane.xlu1 %194 }
 0x138   :  { %v206_v41 = vmul.f32 %v202_v27, %v195_v40 }
 0x13a   :  { %v484_v42 = vsub.f32 %v186_v20, %v206_v41 }
 0x13c   :  { %v214_v43 = vmul.f32 %v484_v42, %v484_v42 }
 0x13e   :  { %221 = vadd.xlane.f32.xlu1 %v214_v43 }
 0x199   :  { %v216_v44 = vpop.xlane.xlu2 %215 }
 0x19a   :  { %v223_v45 = vmul.f32 %v216_v44, %v202_v27 }
 0x19c   :  { %v227_v46 = vadd.f32 1e-05, %v223_v45 }
 0x19e   :  { %340 = vrsqrt.f32 %v227_v46  ;;  %vm237_vm2 = vweird.f32 %v227_v46 }
 0x1a1   :  { %v218_v47 = vpop.xlane.xlu2 %217 }
 0x1a2   :  { %v224_v48 = vmul.f32 %v218_v47, %v202_v27 }
 0x1a4   :  { %v341_v49 = vpop.eup %340  ;;  %v228_v50 = vadd.f32 1e-05, %v224_v48 }
 0x1a5   :  { %v232_v51 = vmul.f32 %v341_v49, %v227_v46  ;;  %vm238_vm1 = vweird.f32 %v341_v49 }
 0x1a6   :  { %342 = vrsqrt.f32 %v228_v50  ;;  %vm239_vm3 = vmor %vm237_vm2, %vm238_vm1  ;;  %vm247_vm5 = vweird.f32 %v228_v50 }
 0x1a7   :  { %v233_v52 = vmul.f32 %v341_v49, %v232_v51 }
 0x1a9   :  { %v234_v53 = vmul.f32 0.5, %v233_v52  ;;  %v220_v54 = vpop.xlane.xlu0 %219 }
 0x1aa   :  { %v225_v55 = vmul.f32 %v220_v54, %v202_v27 }
 0x1ab   :  { %v235_v56 = vsub.f32 1.5, %v234_v53 }
 0x1ac   :  { %v343_v57 = vpop.eup %342  ;;  %v229_v58 = vadd.f32 1e-05, %v225_v55 }
 0x1ad   :  { %v236_v59 = vmul.f32 %v341_v49, %v235_v56  ;;  %v242_v60 = vmul.f32 %v343_v57, %v228_v50  ;;  %vm248_vm4 = vweird.f32 %v343_v57 }
 0x1ae   :  { %344 = vrsqrt.f32 %v229_v58  ;;  %vm249_vm6 = vmor %vm247_vm5, %vm248_vm4  ;;  %vm257_vm8 = vweird.f32 %v229_v58 }
 0x1af   :  { %v240_v62 = vsel %vm239_vm3, %v341_v49, %v236_v59  ;;  %v243_v63 = vmul.f32 %v343_v57, %v242_v60 }
 0x1b0   :  { %v271_v0 = vmul.f32 %v240_v62, %v207_v30 }
 0x1b1   :  { %v244_v2 = vmul.f32 0.5, %v243_v63  ;;  %v222_v3 = vpop.xlane.xlu1 %221 }
 0x1b2   :  { %v279_v4 = vmul.f32 %v336_v61, %v271_v0  ;;  %v226_v5 = vmul.f32 %v222_v3, %v202_v27 }
 0x1b3   :  { %v245_v6 = vsub.f32 1.5, %v244_v2 }
 0x1b4   :  { %v345_v7 = vpop.eup %344  ;;  %v230_v8 = vadd.f32 1e-05, %v226_v5  ;;  %v287_v9 = vadd.f32 %v337_v1, %v279_v4 }
 0x1b5   :  { %v246_v10 = vmul.f32 %v343_v57, %v245_v6  ;;  %v252_v11 = vmul.f32 %v345_v7, %v229_v58  ;;  %vm258_vm7 = vweird.f32 %v345_v7 }
 0x1b6   :  { %346 = vrsqrt.f32 %v230_v8  ;;  %291 = vst [vmem:[#allocation5] sm:$0xff] %v287_v9  ;;  %vm259_vm9 = vmor %vm257_vm8, %vm258_vm7  ;;  %vm267_vm11 = vweird.f32 %v230_v8 }
 0x1b7   :  { %v250_v12 = vsel %vm249_vm6, %v343_v57, %v246_v10  ;;  %v253_v13 = vmul.f32 %v345_v7, %v252_v11 }
 0x1b8   :  { %v272_v14 = vmul.f32 %v250_v12, %v208_v34 }
 0x1b9   :  { %v254_v15 = vmul.f32 0.5, %v253_v13 }
 0x1ba   :  { %v280_v16 = vmul.f32 %v336_v61, %v272_v14 }
 0x1bb   :  { %v255_v17 = vsub.f32 1.5, %v254_v15 }
 0x1bc   :  { %v347_v18 = vpop.eup %346  ;;  %v288_v19 = vadd.f32 %v337_v1, %v280_v16 }
 0x1bd   :  { %v256_v20 = vmul.f32 %v345_v7, %v255_v17  ;;  %v262_v21 = vmul.f32 %v347_v18, %v230_v8  ;;  %vm268_vm10 = vweird.f32 %v347_v18 }
 0x1be   :  { %292 = vst [vmem:[#allocation5 + $0x8] sm:$0xff] %v288_v19  ;;  %vm269_vm12 = vmor %vm267_vm11, %vm268_vm10 }
 0x1bf   :  { %v260_v22 = vsel %vm259_vm9, %v345_v7, %v256_v20  ;;  %v263_v23 = vmul.f32 %v347_v18, %v262_v21 }
 0x1c0   :  { %v273_v24 = vmul.f32 %v260_v22, %v480_v38 }
 0x1c1   :  { %v264_v25 = vmul.f32 0.5, %v263_v23 }
 0x1c2   :  { %v281_v26 = vmul.f32 %v336_v61, %v273_v24 }
 0x1c3   :  { %v265_v27 = vsub.f32 1.5, %v264_v25 }
 0x1c4   :  { %v289_v28 = vadd.f32 %v337_v1, %v281_v26 }
 0x1c5   :  { %v266_v29 = vmul.f32 %v347_v18, %v265_v27 }
 0x1c6   :  { %293 = vst [vmem:[#allocation5 + $0x10] sm:$0xff] %v289_v28 }
 0x1c7   :  { %v270_v30 = vsel %vm269_vm12, %v347_v18, %v266_v29 }
 0x1c8   :  { %v274_v31 = vmul.f32 %v270_v30, %v484_v42 }
 0x1ca   :  { %v282_v32 = vmul.f32 %v336_v61, %v274_v31 }
 0x1cc   :  { %v290_v33 = vadd.f32 %v337_v1, %v282_v32 }
 0x1ce   :  { %294 = vst [vmem:[#allocation5 + $0x18] sm:$0xff] %v290_v33 }
 0x1cf   :  { %307 = dma.vmem_to_hbm [thread:$0]  %s300_s4, 512, %s302_s30, [#allocation4], %s401_s23, %s401_s23, %s402_s24  }
 0x1d0   :  { %398 = dma.done.wait [#allocation4], 512  }
 0x1d1   :  { %399 = vsyncadd [#allocation4], 4294966784 }
 0x1d2   :  { %312 = vsyncpa [#allocation3], 1 }
 0x1d3   :  { %313 = vsyncpa [#allocation4], 1 }

</bundles_post_ra>
